<compile_context>
chip_gen: v6e
topology: v6e:2x2x1
jax: 0.10.0
libtpu: 0.0.40
codegen_flags: <defaults>
</compile_context>

<pallas_src>
import functools

import jax
import jax.numpy as jnp
from jax.experimental import pallas as pl
from jax.experimental.pallas import tpu as pltpu


def _wsqmse_kernel(out_ref, tgt_ref, mse_ref, num_acc, den_acc, *,
                   inst_factor, n_rows, n_cols, tm, tk):
    """One (TM, TK) tile: accumulate per-row weighted-MSE numerator/denominator.

    out_ref, tgt_ref : (TM, TK) VMEM refs (original input dtype)
    mse_ref          : (TM, 1)  VMEM ref, float32 per-row weighted MSE
    num_acc, den_acc : (TM, 1)  float32 VMEM scratch accumulators
    """
    i = pl.program_id(0)          # row-tile index   ("parallel")
    k = pl.program_id(1)          # column-tile index ("arbitrary" reduction)

    @pl.when(k == 0)
    def _():
        num_acc[...] = jnp.zeros_like(num_acc)
        den_acc[...] = jnp.zeros_like(den_acc)

    # Cast to f32 inside the kernel (inputs may be bf16; keeps HBM traffic low).
    o = out_ref[...].astype(jnp.float32)
    t = tgt_ref[...].astype(jnp.float32)

    rows_partial = (n_rows % tm) != 0       # static: masks only emitted if needed
    cols_partial = (n_cols % tk) != 0

    if rows_partial:
        # Padded rows -> neutral (o == t == 1): mse 0, never NaN; their outputs
        # are clipped on writeback and never reach the final mean anyway.
        row_ids = jax.lax.broadcasted_iota(jnp.int32, o.shape, 0) + i * tm
        rmask = row_ids < n_rows
        o = jnp.where(rmask, o, 1.0)
        t = jnp.where(rmask, t, 1.0)

    cmask = None
    if cols_partial:
        # Padded lanes -> zero contribution to both numerator and denominator.
        col_ids = jax.lax.broadcasted_iota(jnp.int32, o.shape, 1) + k * tk
        cmask = col_ids < n_cols
        o = jnp.where(cmask, o, 0.0)
        t = jnp.where(cmask, t, 0.0)

    w = jnp.sqrt(t) + inst_factor                                # (TM, TK)
    if cols_partial:
        w = jnp.where(cmask, w, 0.0)

    diff = o - t
    num_acc[...] += jnp.sum(w * diff * diff, axis=1, keepdims=True)   # (TM, 1)
    den_acc[...] += jnp.sum(w, axis=1, keepdims=True)                 # (TM, 1)

    @pl.when(k == pl.num_programs(1) - 1)
    def _():
        # approx reciprocal -> EUP slot (effectively free); ~1e-3-class rel. error.
        mse_ref[...] = num_acc[...] * pl.reciprocal(den_acc[...], approx=True)


# Per grid step the pipeline holds 2 inputs x 2 buffers x TM*TK*itemsize bytes.
_VMEM_STEP_BUDGET = 12 * 1024 * 1024


def _pick_tiles(n_rows, n_cols, itemsize, block_rows=None, block_cols=None):
    """Choose (TM, TK). Prefer full-width rows; only tile columns for huge D."""
    per_elem = 4 * itemsize                  # 2 inputs x 2 pipeline buffers

    # --- columns -------------------------------------------------------------
    if block_cols is not None:
        tk = int(block_cols)
    elif per_elem * 8 * n_cols <= _VMEM_STEP_BUDGET:
        tk = n_cols                          # whole row fits even at minimum TM
    else:
        tk = (_VMEM_STEP_BUDGET // (per_elem * 8) // 128) * 128
    tk = min(tk, n_cols)
    if tk < n_cols:                          # partial column tiles: lane-aligned
        tk = max(128, (tk // 128) * 128)

    # --- rows ----------------------------------------------------------------
    if block_rows is not None:
        tm = int(block_rows)
    else:
        tm = _VMEM_STEP_BUDGET // (per_elem * tk)
        tm = min(tm, 1024)                   # diminishing returns past ~1k rows
    tm = min(tm, n_rows)
    if tm < n_rows:                          # partial row tiles: sublane-aligned
        tm = max(8, (tm // 8) * 8)
    return tm, tk


def weight_sqrt_mse_loss(output, target, inst_factor=0.5, *,
                         block_rows=None, block_cols=None):
    """Pallas TPU implementation of WeightSqrtMSELoss.forward.

    output, target: (N, D) arrays (any float dtype; math done in float32).
    Returns a scalar float32 loss.
    """
    assert output.shape == target.shape and output.ndim == 2
    N, D = output.shape
    itemsize = jnp.dtype(output.dtype).itemsize

    tm, tk = _pick_tiles(N, D, itemsize, block_rows, block_cols)
    grid = (pl.cdiv(N, tm), pl.cdiv(D, tk))

    kernel = functools.partial(
        _wsqmse_kernel,
        inst_factor=float(inst_factor),
        n_rows=N, n_cols=D, tm=tm, tk=tk,
    )

    cost = pl.CostEstimate(
        flops=5 * N * D,               # sub, mul, mul, two row-sums (approx.)
        transcendentals=N * D,         # sqrt
        bytes_accessed=2 * N * D * itemsize + N * 4,
    )

    mse_rows = pl.pallas_call(
        kernel,
        out_shape=jax.ShapeDtypeStruct((N, 1), jnp.float32),
        grid_spec=pltpu.PrefetchScalarGridSpec(
            num_scalar_prefetch=0,
            grid=grid,
            in_specs=[
                pl.BlockSpec((tm, tk), lambda i, k: (i, k)),
                pl.BlockSpec((tm, tk), lambda i, k: (i, k)),
            ],
            out_specs=pl.BlockSpec((tm, 1), lambda i, k: (i, 0)),
            scratch_shapes=[pltpu.VMEM((tm, 1), jnp.float32),
                            pltpu.VMEM((tm, 1), jnp.float32)],
        ),
        compiler_params=pltpu.CompilerParams(
            dimension_semantics=("parallel", "arbitrary")),
        cost_estimate=cost,
    )(output, target)

    # Tiny final reduction over N values in plain JAX; divides by the true N.
    return jnp.mean(mse_rows[:, 0])


def _reference(output, target, inst_factor):
    o = output.astype(jnp.float32)
    t = target.astype(jnp.float32)
    w = jnp.sqrt(t) + inst_factor
    mse_w = jnp.sum(w * (o - t) ** 2, axis=1) / jnp.sum(w, axis=1)
    return jnp.mean(mse_w)


if __name__ == "__main__":
    key = jax.random.PRNGKey(0)
    k1, k2 = jax.random.split(key)
    inst_factor = 0.5

    # Small demo shape: D on lanes (multiple of 128), N on sublanes, N chosen
    # so tiled paths exercise a masked partial last row tile.
    N, D = 20, 256
    target = jax.random.uniform(k1, (N, D), dtype=jnp.float32,
                                minval=0.0, maxval=4.0)
    output = target + 0.1 * jax.random.normal(k2, (N, D), dtype=jnp.float32)

    ref = _reference(output, target, inst_factor)

    # 1) Auto tile sizing (single full-extent tile at this small shape).
    loss = jax.block_until_ready(weight_sqrt_mse_loss(output, target, inst_factor))
    assert jnp.allclose(loss, ref, rtol=2e-3, atol=1e-6), (loss, ref)

    # 2) Forced row tiling: TM=8 -> 3 row steps, last tile masked (20 % 8 != 0).
    loss_rt = jax.block_until_ready(
        weight_sqrt_mse_loss(output, target, inst_factor, block_rows=8))
    assert jnp.allclose(loss_rt, ref, rtol=2e-3, atol=1e-6), (loss_rt, ref)

    # 3) Forced row + column tiling: exercises the accumulator / reduction axis.
    loss_ct = jax.block_until_ready(
        weight_sqrt_mse_loss(output, target, inst_factor,
                             block_rows=8, block_cols=128))
    assert jnp.allclose(loss_ct, ref, rtol=2e-3, atol=1e-6), (loss_ct, ref)

    # 4) D not a multiple of the column tile -> masked partial column tile.
    k3, k4 = jax.random.split(k2)
    N2, D2 = 20, 200
    t2 = jax.random.uniform(k3, (N2, D2), dtype=jnp.float32, minval=0.0, maxval=4.0)
    o2 = t2 + 0.1 * jax.random.normal(k4, (N2, D2), dtype=jnp.float32)
    ref2 = _reference(o2, t2, inst_factor)
    loss2 = jax.block_until_ready(
        weight_sqrt_mse_loss(o2, t2, inst_factor, block_rows=8, block_cols=128))
    assert jnp.allclose(loss2, ref2, rtol=2e-3, atol=1e-6), (loss2, ref2)

    # 5) bf16 inputs: the f32 cast happens inside the kernel (halved HBM traffic).
    out_bf16 = output.astype(jnp.bfloat16)
    tgt_bf16 = target.astype(jnp.bfloat16)
    ref_bf16 = _reference(out_bf16, tgt_bf16, inst_factor)
    loss_bf16 = jax.block_until_ready(
        weight_sqrt_mse_loss(out_bf16, tgt_bf16, inst_factor, block_rows=8))
    assert jnp.allclose(loss_bf16, ref_bf16, rtol=1e-2, atol=1e-4), (loss_bf16, ref_bf16)

    print("KERNEL_OK")
</pallas_src>

<mosaic_0001>
module attributes {stable_mosaic.version = 11 : i64} {
  func.func @_wsqmse_kernel(%arg0: i32, %arg1: i32, %arg2: memref<20x256xf32, #tpu.memory_space<vmem>>, %arg3: memref<20x256xf32, #tpu.memory_space<vmem>>, %arg4: memref<20x1xf32, #tpu.memory_space<vmem>>, %arg5: memref<20x1xf32, #tpu.memory_space<vmem>>, %arg6: memref<20x1xf32, #tpu.memory_space<vmem>>) attributes {dimension_semantics = [#tpu.dimension_semantics<parallel>, #tpu.dimension_semantics<arbitrary>], iteration_bounds = array<i64: 1, 1>, scalar_prefetch = 0 : i64, scratch_operands = 2 : i64, tpu.core_type = #tpu.core_type<tc>, window_params = [{transform_indices = @transform_0, window_bounds = array<i64: 20, 256>}, {transform_indices = @transform_1, window_bounds = array<i64: 20, 256>}, {transform_indices = @transform_2, window_bounds = array<i64: 20, 1>}]} {
    %c0_i32 = arith.constant 0 : i32
    %0 = arith.cmpi eq, %arg1, %c0_i32 : i32
    %1 = arith.extui %0 : i1 to i32
    %c0_i32_0 = arith.constant 0 : i32
    %2 = arith.cmpi ne, %1, %c0_i32_0 : i32
    scf.if %2 {
      %cst_16 = arith.constant 0.000000e+00 : f32
      %24 = vector.broadcast %cst_16 : f32 to vector<20x1xf32>
      %c0_17 = arith.constant 0 : index
      %c0_18 = arith.constant 0 : index
      %25 = vector.load %arg5[%c0_17, %c0_18] : memref<20x1xf32, #tpu.memory_space<vmem>>, vector<20x1xf32>
      tpu.vector_store %arg5[%c0_17, %c0_18], %24 {strides = array<i32>} : memref<20x1xf32, #tpu.memory_space<vmem>>, vector<20x1xf32>,
      %cst_19 = arith.constant 0.000000e+00 : f32
      %26 = vector.broadcast %cst_19 : f32 to vector<20x1xf32>
      %c0_20 = arith.constant 0 : index
      %c0_21 = arith.constant 0 : index
      %27 = vector.load %arg6[%c0_20, %c0_21] : memref<20x1xf32, #tpu.memory_space<vmem>>, vector<20x1xf32>
      tpu.vector_store %arg6[%c0_20, %c0_21], %26 {strides = array<i32>} : memref<20x1xf32, #tpu.memory_space<vmem>>, vector<20x1xf32>,
    } else {
    }
    %c0 = arith.constant 0 : index
    %c0_1 = arith.constant 0 : index
    %3 = vector.load %arg2[%c0, %c0_1] : memref<20x256xf32, #tpu.memory_space<vmem>>, vector<20x256xf32>
    %c0_2 = arith.constant 0 : index
    %c0_3 = arith.constant 0 : index
    %4 = vector.load %arg3[%c0_2, %c0_3] : memref<20x256xf32, #tpu.memory_space<vmem>>, vector<20x256xf32>
    %5 = math.sqrt %4 : vector<20x256xf32>
    %cst = arith.constant 5.000000e-01 : f32
    %6 = vector.broadcast %cst : f32 to vector<20x256xf32>
    %7 = arith.addf %5, %6 : vector<20x256xf32>
    %8 = arith.subf %3, %4 : vector<20x256xf32>
    %c0_4 = arith.constant 0 : index
    %c0_5 = arith.constant 0 : index
    %9 = vector.load %arg5[%c0_4, %c0_5] : memref<20x1xf32, #tpu.memory_space<vmem>>, vector<20x1xf32>
    %10 = arith.mulf %7, %8 : vector<20x256xf32>
    %11 = arith.mulf %10, %8 : vector<20x256xf32>
    %cst_6 = arith.constant dense<0.000000e+00> : vector<20xf32>
    %12 = vector.multi_reduction <add>, %11, %cst_6 [1] : vector<20x256xf32> to vector<20xf32>
    %13 = vector.shape_cast %12 : vector<20xf32> to vector<20x1xf32>
    %14 = arith.addf %9, %13 : vector<20x1xf32>
    %c0_7 = arith.constant 0 : index
    %c0_8 = arith.constant 0 : index
    %15 = vector.load %arg5[%c0_7, %c0_8] : memref<20x1xf32, #tpu.memory_space<vmem>>, vector<20x1xf32>
    tpu.vector_store %arg5[%c0_7, %c0_8], %14 {strides = array<i32>} : memref<20x1xf32, #tpu.memory_space<vmem>>, vector<20x1xf32>,
    %c0_9 = arith.constant 0 : index
    %c0_10 = arith.constant 0 : index
    %16 = vector.load %arg6[%c0_9, %c0_10] : memref<20x1xf32, #tpu.memory_space<vmem>>, vector<20x1xf32>
    %cst_11 = arith.constant dense<0.000000e+00> : vector<20xf32>
    %17 = vector.multi_reduction <add>, %7, %cst_11 [1] : vector<20x256xf32> to vector<20xf32>
    %18 = vector.shape_cast %17 : vector<20xf32> to vector<20x1xf32>
    %19 = arith.addf %16, %18 : vector<20x1xf32>
    %c0_12 = arith.constant 0 : index
    %c0_13 = arith.constant 0 : index
    %20 = vector.load %arg6[%c0_12, %c0_13] : memref<20x1xf32, #tpu.memory_space<vmem>>, vector<20x1xf32>
    tpu.vector_store %arg6[%c0_12, %c0_13], %19 {strides = array<i32>} : memref<20x1xf32, #tpu.memory_space<vmem>>, vector<20x1xf32>,
    %c0_i32_14 = arith.constant 0 : i32
    %21 = arith.cmpi eq, %arg1, %c0_i32_14 : i32
    %22 = arith.extui %21 : i1 to i32
    %c0_i32_15 = arith.constant 0 : i32
    %23 = arith.cmpi ne, %22, %c0_i32_15 : i32
    scf.if %23 {
      %c0_16 = arith.constant 0 : index
      %c0_17 = arith.constant 0 : index
      %24 = vector.load %arg5[%c0_16, %c0_17] : memref<20x1xf32, #tpu.memory_space<vmem>>, vector<20x1xf32>
      %c0_18 = arith.constant 0 : index
      %c0_19 = arith.constant 0 : index
      %25 = vector.load %arg6[%c0_18, %c0_19] : memref<20x1xf32, #tpu.memory_space<vmem>>, vector<20x1xf32>
      %26 = tpu.reciprocal %25 {approx = true} : vector<20x1xf32> -> vector<20x1xf32>
      %27 = arith.mulf %24, %26 : vector<20x1xf32>
      %c0_20 = arith.constant 0 : index
      %c0_21 = arith.constant 0 : index
      %28 = vector.load %arg4[%c0_20, %c0_21] : memref<20x1xf32, #tpu.memory_space<vmem>>, vector<20x1xf32>
      tpu.vector_store %arg4[%c0_20, %c0_21], %27 {strides = array<i32>} : memref<20x1xf32, #tpu.memory_space<vmem>>, vector<20x1xf32>,
    } else {
    }
    return
  }
  func.func @transform_0(%arg0: i32, %arg1: i32) -> (i32, i32) {
    %c0_i32 = arith.constant 0 : i32
    return %arg0, %arg1 : i32, i32
  }
  func.func @transform_1(%arg0: i32, %arg1: i32) -> (i32, i32) {
    %c0_i32 = arith.constant 0 : i32
    return %arg0, %arg1 : i32, i32
  }
  func.func @transform_2(%arg0: i32, %arg1: i32) -> (i32, i32) {
    %c0_i32 = arith.constant 0 : i32
    %c0_i32_0 = arith.constant 0 : i32
    return %arg0, %c0_i32 : i32, i32
  }
}

</mosaic_0001>

<bundles_post_ra>
// kernel: tpu_custom_call.1
= control target key start
LH: loop header
LB: loop body
LE: loop exit
PB: predicated region body
PF: predicated region fallthrough
CT: control target
= control target key end

     0   :  { %7 = vsyncpa [#allocation5], 0  ;;  %s357_s0 = inlined_call_operand.hbm [shape: f32[20,256], index: 0, kind: input, shape index: {}]   ;;  %s358_s1 = inlined_call_operand.hbm [shape: f32[20,256], index: 1, kind: input, shape index: {}]   ;;  %s359_s2 = inlined_call_operand.vmem [shape: f32[20,1], index: 2, kind: output, shape index: {}]  }
   0x1   :  { %8 = vsyncpa [#allocation7], 0  ;;  %s263_s9 = smov [#allocation4]  }
   0x2   :  { %s14_s10 = sshll.u32 %s263_s9, 4  ;;  %s15_s10 = int_to_ptr.vmem [resolvable:$true] %s14_s10 }
   0x3   :  { %s227_s11 = scalar_lea.vmem %s15_s10, 768  ;;  %p232_p1 = scmp.lt.s32.totalorder %s15_s10, %s15_s10 }
   0x4   :  { %p228_p0 = scmp.ne.s32.totalorder %s15_s10, %s227_s11  ;;  %p233_p2 = scmp.lt.s32.totalorder %s227_s11, %s227_s11 }
   0x6   :  { %p234_p3 = por %p233_p2, %p232_p1 }
   0x8   :  { %p235_p4 = pnand %p234_p3, %p228_p0 }
   0xa   :  { %238 = shalt.err (!%p235_p4)
}
   0xb   :  { %s264_s12 = smov 256   ;;  %s265_s13 = smov 16  }
   0xc   :  { %20 = dma.hbm_to_vmem [thread:$0]  %s357_s0, 768, %s15_s10, [#allocation5], %s264_s12, %s264_s12, %s265_s13  }
   0xd   :  { %s266_s16 = smov [#allocation6]  }
   0xe   :  { %s26_s17 = sshll.u32 %s266_s16, 4  ;;  %s27_s17 = int_to_ptr.vmem [resolvable:$true] %s26_s17 }
   0xf   :  { %s247_s18 = scalar_lea.vmem %s27_s17, 768  ;;  %p252_p6 = scmp.lt.s32.totalorder %s27_s17, %s27_s17 }
  0x10   :  { %p248_p5 = scmp.ne.s32.totalorder %s27_s17, %s247_s18  ;;  %p253_p7 = scmp.lt.s32.totalorder %s247_s18, %s247_s18 }
  0x12   :  { %p254_p8 = por %p253_p7, %p252_p6 }
  0x14   :  { %p255_p9 = pnand %p254_p8, %p248_p5 }
  0x16   :  { %258 = shalt.err (!%p255_p9)
}
  0x17   :  { %32 = dma.hbm_to_vmem [thread:$0]  %s358_s1, 768, %s27_s17, [#allocation7], %s264_s12, %s264_s12, %s265_s13  }
  0x18   :  { %259 = dma.done.wait [#allocation5], 768  }
  0x19   :  { %260 = vsyncadd [#allocation5], 4294966528 }
  0x1a   :  { %261 = dma.done.wait [#allocation7], 768  }
  0x1b   :  { %262 = vsyncadd [#allocation7], 4294966528  ;;  %vm43_vm0 = vcmask 7168   ;;  %v267_v0 = vmov 0.0   ;;  %v57_v1 = vld [vmem:[#allocation6] sm:$0xff]  ;;  %v58_v2 = vld [vmem:[#allocation6 + $0x8] sm:$0xff] }
  0x1c   :  { %48 = vst.msk [vmem:[#allocation3] sm:$0xff] %vm43_vm0, %v267_v0  ;;  %44 = vst.msk [vmem:[#allocation2] sm:$0xff] %vm43_vm0, %v267_v0  ;;  %201 = vrsqrt.f32 %v57_v1  ;;  %v61_v3 = vld [vmem:[#allocation6 + $0x20] sm:$0xf]  ;;  %v62_v4 = vld [vmem:[#allocation6 + $0x28] sm:$0xf] }
  0x1d   :  { %45 = vst.msk [vmem:[#allocation2 + $0x8] sm:$0xff] %vm43_vm0, %v267_v0  ;;  %49 = vst.msk [vmem:[#allocation3 + $0x8] sm:$0xff] %vm43_vm0, %v267_v0  ;;  %203 = vrsqrt.f32 %v58_v2  ;;  %v297_v5 = vld [vmem:[#allocation6 + $0x10] sm:$0xff]  ;;  %v299_v6 = vld [vmem:[#allocation6 + $0x18] sm:$0xff]  ;;  %vm65_vm1 = vcmp.eq.f32.partialorder %v57_v1, inf  ;;  %vm67_vm2 = vcmp.eq.f32.partialorder %v57_v1, 0.0 }
  0x1e   :  { %205 = vrsqrt.f32 %v61_v3  ;;  %v51_v7 = vld [vmem:[#allocation4] sm:$0xff]  ;;  %v52_v8 = vld [vmem:[#allocation4 + $0x8] sm:$0xff]  ;;  %v68_v9 = vand.u32 2147483648, %v57_v1  ;;  %vm72_vm3 = vcmp.eq.f32.partialorder %v58_v2, inf  ;;  %vm74_vm4 = vcmp.eq.f32.partialorder %v58_v2, 0.0  ;;  %v53_v22 = vld [vmem:[#allocation4 + $0x10] sm:$0xff] }
  0x1f   :  { %207 = vrsqrt.f32 %v62_v4  ;;  %v75_v10 = vand.u32 2147483648, %v58_v2  ;;  %vm138_vm5 = vcmask 1043456   ;;  %v55_v11 = vld [vmem:[#allocation4 + $0x20] sm:$0xf]  ;;  %v56_v12 = vld [vmem:[#allocation4 + $0x28] sm:$0xf]  ;;  %v111_v13 = vsub.f32 %v51_v7, %v57_v1 }
  0x20   :  { %209 = vrsqrt.f32 %v297_v5  ;;  %v112_v14 = vsub.f32 %v52_v8, %v58_v2  ;;  %vm93_vm6 = vcmp.eq.f32.partialorder %v61_v3, inf  ;;  %vm95_vm7 = vcmp.eq.f32.partialorder %v61_v3, 0.0  ;;  %v54_v26 = vld [vmem:[#allocation4 + $0x18] sm:$0xff] }
  0x21   :  { %211 = vrsqrt.f32 %v299_v6  ;;  %v96_v16 = vand.u32 2147483648, %v61_v3  ;;  %vm100_vm8 = vcmp.eq.f32.partialorder %v62_v4, inf  ;;  %vm102_vm9 = vcmp.eq.f32.partialorder %v62_v4, 0.0 }
  0x22   :  { %v103_v17 = vand.u32 2147483648, %v62_v4  ;;  %v115_v20 = vsub.f32 %v55_v11, %v61_v3  ;;  %v116_v21 = vsub.f32 %v56_v12, %v62_v4  ;;  %vm79_vm10 = vcmp.eq.f32.partialorder %v297_v5, inf }
  0x23   :  { %vm81_vm11 = vcmp.eq.f32.partialorder %v297_v5, 0.0  ;;  %v82_v25 = vand.u32 2147483648, %v297_v5  ;;  %vm86_vm12 = vcmp.eq.f32.partialorder %v299_v6, inf  ;;  %vm88_vm13 = vcmp.eq.f32.partialorder %v299_v6, 0.0 }
  0x24   :  { %v89_v30 = vand.u32 2147483648, %v299_v6  ;;  %v113_v34 = vsub.f32 %v53_v22, %v297_v5  ;;  %v114_v39 = vsub.f32 %v54_v26, %v299_v6  ;;  %vm46_vm14 = vcmask 3072   ;;  %v117_v22 = vld [vmem:[#allocation2] sm:$0xff] }
  0x25   :  { %50 = vst.msk [vmem:[#allocation3 + $0x10] sm:$0xf] %vm46_vm14, %v267_v0  ;;  %47 = vst.msk [vmem:[#allocation2 + $0x10] sm:$0xf] %vm46_vm14, %v267_v0 }
  0x29   :  { %v202_v15 = vpop.eup %201 }
  0x2a   :  { %v204_v18 = vpop.eup %203  ;;  %v64_v19 = vmul.f32 %v202_v15, %v57_v1 }
  0x2b   :  { %v206_v23 = vpop.eup %205  ;;  %v71_v24 = vmul.f32 %v204_v18, %v58_v2 }
  0x2c   :  { %v208_v27 = vpop.eup %207  ;;  %v66_v28 = vsel %vm65_vm1, %v57_v1, %v64_v19  ;;  %v92_v29 = vmul.f32 %v206_v23, %v61_v3  ;;  %v153_v19 = vld [vmem:[#allocation3 + $0x8] sm:$0xff] }
  0x2d   :  { %v69_v31 = vsel %vm67_vm2, %v68_v9, %v66_v28  ;;  %v73_v32 = vsel %vm72_vm3, %v58_v2, %v71_v24  ;;  %v99_v33 = vmul.f32 %v208_v27, %v62_v4  ;;  %v210_v35 = vpop.eup %209  ;;  %v119_v27 = vld [vmem:[#allocation2 + $0x10] sm:$0xf] }
  0x2e   :  { %v76_v36 = vsel %vm74_vm4, %v75_v10, %v73_v32  ;;  %v105_v37 = vadd.f32 0.5, %v69_v31  ;;  %v94_v38 = vsel %vm93_vm6, %v61_v3, %v92_v29  ;;  %v212_v40 = vpop.eup %211  ;;  %v78_v44 = vmul.f32 %v210_v35, %v297_v5 }
  0x2f   :  { %v106_v41 = vadd.f32 0.5, %v76_v36  ;;  %v97_v42 = vsel %vm95_vm7, %v96_v16, %v94_v38  ;;  %v101_v43 = vsel %vm100_vm8, %v62_v4, %v99_v33  ;;  %v85_v48 = vmul.f32 %v212_v40, %v299_v6 }
  0x30   :  { %v120_v45 = vmul.f32 %v111_v13, %v105_v37  ;;  %v104_v46 = vsel %vm102_vm9, %v103_v17, %v101_v43  ;;  %v109_v47 = vadd.f32 0.5, %v97_v42  ;;  %v80_v52 = vsel %vm79_vm10, %v297_v5, %v78_v44  ;;  %v154_v17 = vld [vmem:[#allocation3 + $0x10] sm:$0xf] }
  0x31   :  { %v155_v49 = vadd.f32 %v106_v41, %v105_v37  ;;  %v121_v50 = vmul.f32 %v112_v14, %v106_v41  ;;  %v110_v51 = vadd.f32 0.5, %v104_v46  ;;  %v83_v55 = vsel %vm81_vm11, %v82_v25, %v80_v52  ;;  %v118_v25 = vld [vmem:[#allocation2 + $0x8] sm:$0xff] }
  0x32   :  { %v161_v53 = vsel %vm138_vm5, %v109_v47, 0.0  ;;  %v124_v54 = vmul.f32 %v115_v20, %v109_v47  ;;  %v87_v56 = vsel %vm86_vm12, %v299_v6, %v85_v48  ;;  %v107_v60 = vadd.f32 0.5, %v83_v55 }
  0x33   :  { %156 = vadd.xlane.f32.xlu0 %v155_v49  ;;  %v162_v57 = vsel %vm138_vm5, %v110_v51, 0.0  ;;  %v125_v58 = vmul.f32 %v116_v21, %v110_v51  ;;  %v90_v59 = vsel %vm88_vm13, %v89_v30, %v87_v56  ;;  %v126_v63 = vmul.f32 %v120_v45, %v111_v13  ;;  %v152_v13 = vld [vmem:[#allocation3] sm:$0xff] }
  0x34   :  { %v163_v61 = vadd.f32 %v162_v57, %v161_v53  ;;  %v108_v62 = vadd.f32 0.5, %v90_v59  ;;  %v127_v1 = vmul.f32 %v121_v50, %v112_v14  ;;  %v122_v2 = vmul.f32 %v113_v34, %v107_v60 }
  0x35   :  { %v130_v3 = vmul.f32 %v124_v54, %v115_v20  ;;  %v131_v4 = vmul.f32 %v125_v58, %v116_v21 }
  0x36   :  { %164 = vadd.xlane.f32.xlu1 %v163_v61  ;;  %v158_v5 = vadd.f32 %v108_v62, %v107_v60  ;;  %v132_v7 = vadd.f32 %v127_v1, %v126_v63  ;;  %v123_v8 = vmul.f32 %v114_v39, %v108_v62  ;;  %v128_v9 = vmul.f32 %v122_v2, %v113_v34 }
  0x37   :  { %v139_v10 = vsel %vm138_vm5, %v130_v3, 0.0  ;;  %v140_v11 = vsel %vm138_vm5, %v131_v4, 0.0 }
  0x38   :  { %159 = vadd.xlane.f32.xlu0 %v158_v5  ;;  %v129_v6 = vmul.f32 %v123_v8, %v114_v39  ;;  %v141_v15 = vadd.f32 %v140_v11, %v139_v10 }
  0x3a   :  { %133 = vadd.xlane.f32.xlu1 %v132_v7  ;;  %v135_v12 = vadd.f32 %v129_v6, %v128_v9 }
  0x3c   :  { %136 = vadd.xlane.f32.xlu0 %v135_v12 }
  0x3e   :  { %142 = vadd.xlane.f32.xlu1 %v141_v15 }
  0xbc   :  { %v157_v14 = vpop.xlane.xlu0 %156 }
  0xbd   :  { %v166_v16 = vadd.f32 %v157_v14, %v152_v13 }
  0xbf   :  { %169 = vst.msk [vmem:[#allocation3] sm:$0xff] %vm43_vm0, %v166_v16  ;;  %v165_v18 = vpop.xlane.xlu1 %164 }
  0xc0   :  { %v168_v20 = vadd.f32 %v165_v18, %v154_v17 }
  0xc1   :  { %v160_v21 = vpop.xlane.xlu0 %159 }
  0xc2   :  { %171 = vst.msk [vmem:[#allocation3 + $0x10] sm:$0xf] %vm46_vm14, %v168_v20  ;;  %v167_v23 = vadd.f32 %v160_v21, %v153_v19 }
  0xc3   :  { %v134_v24 = vpop.xlane.xlu1 %133 }
  0xc4   :  { %170 = vst.msk [vmem:[#allocation3 + $0x8] sm:$0xff] %vm43_vm0, %v167_v23  ;;  %v144_v0 = vadd.f32 %v134_v24, %v117_v22 }
  0xc5   :  { %v137_v26 = vpop.xlane.xlu0 %136 }
  0xc6   :  { %v178_v28 = vld [vmem:[#allocation3] sm:$0xff]  ;;  %148 = vst.msk [vmem:[#allocation2] sm:$0xff] %vm43_vm0, %v144_v0  ;;  %v145_v29 = vadd.f32 %v137_v26, %v118_v25 }
  0xc7   :  { %213 = vrcp.f32 %v178_v28  ;;  %v143_v30 = vpop.xlane.xlu1 %142 }
  0xc8   :  { %149 = vst.msk [vmem:[#allocation2 + $0x8] sm:$0xff] %vm43_vm0, %v145_v29  ;;  %v146_v31 = vadd.f32 %v143_v30, %v119_v27 }
  0xc9   :  { %v180_v32 = vld [vmem:[#allocation3 + $0x10] sm:$0xf] }
  0xca   :  { %215 = vrcp.f32 %v180_v32  ;;  %151 = vst.msk [vmem:[#allocation2 + $0x10] sm:$0xf] %vm46_vm14, %v146_v31 }
  0xcb   :  { %v179_v33 = vld [vmem:[#allocation3 + $0x8] sm:$0xff] }
  0xcc   :  { %217 = vrcp.f32 %v179_v33 }
  0xcd   :  { %v175_v34 = vld [vmem:[#allocation2] sm:$0xff] }
  0xcf   :  { %v176_v39 = vld [vmem:[#allocation2 + $0x8] sm:$0xff] }
  0xd1   :  { %v177_v37 = vld [vmem:[#allocation2 + $0x10] sm:$0xf] }
  0xd4   :  { %v214_v35 = vpop.eup %213 }
  0xd5   :  { %v184_v36 = vmul.f32 %v214_v35, %v175_v34 }
  0xd7   :  { %v216_v38 = vpop.eup %215  ;;  %187 = vst.msk [vmem:[%s359_s2] sm:$0xff] %vm43_vm0, %v184_v36 }
  0xd8   :  { %v186_v40 = vmul.f32 %v216_v38, %v177_v37 }
  0xd9   :  { %v218_v41 = vpop.eup %217 }
  0xda   :  { %v185_v42 = vmul.f32 %v218_v41, %v176_v39  ;;  %189 = vst.msk [vmem:[%s359_s2 + $0x10] sm:$0xf] %vm46_vm14, %v186_v40 }
  0xdc   :  { %188 = vst.msk [vmem:[%s359_s2 + $0x8] sm:$0xff] %vm43_vm0, %v185_v42 }
  0xdd   :  { %194 = vsyncpa [#allocation5], 1 }
  0xde   :  { %195 = vsyncpa [#allocation7], 1 }

</bundles_post_ra>
